<compile_context>
chip_gen: v7x
topology: tpu7x:2x2x1
jax: 0.10.0
libtpu: 0.0.40
codegen_flags: <defaults>
</compile_context>

<pallas_src>
import jax
import jax.numpy as jnp
from jax.experimental import pallas as pl
from jax.experimental.pallas import tpu as pltpu

LATENT_DIM = 100
HIDDEN_DIM = 256
IMAGE_DIM = 28 * 28          # 784

LATENT_PAD = 128             # 100 -> 128 (one full lane group)


def _round_up(x, m):
    return ((x + m - 1) // m) * m


def generator_kernel(z_ref, w1_ref, b1_ref, w2_ref, b2_ref, w3_ref, b3_ref,
                     out_ref):
    # Layer 1: Linear(128(pad of 100) -> 256) + ReLU.  bf16 MXU, f32 accumulate.
    h1 = jnp.dot(z_ref[...], w1_ref[...],
                 preferred_element_type=jnp.float32) + b1_ref[...]
    h1 = jnp.maximum(h1, 0.0).astype(jnp.bfloat16)

    # Layer 2: Linear(256 -> 256) + ReLU.
    h2 = jnp.dot(h1, w2_ref[...],
                 preferred_element_type=jnp.float32) + b2_ref[...]
    h2 = jnp.maximum(h2, 0.0).astype(jnp.bfloat16)

    # Layer 3: Linear(256 -> 784) + Tanh (tanh -> EUP), store in out dtype.
    h3 = jnp.dot(h2, w3_ref[...],
                 preferred_element_type=jnp.float32) + b3_ref[...]
    out_ref[...] = jnp.tanh(h3).astype(out_ref.dtype)


def prepare_params(params_f32):
    """Pad w1 rows 100->128 and cast weights to bf16 (biases stay f32)."""
    w1, b1, w2, b2, w3, b3 = params_f32
    w1p = jnp.zeros((LATENT_PAD, HIDDEN_DIM), jnp.float32).at[:LATENT_DIM].set(w1)
    return (w1p.astype(jnp.bfloat16), b1,
            w2.astype(jnp.bfloat16), b2,
            w3.astype(jnp.bfloat16), b3)


def generator_forward(z, padded_params, tb=None, out_dtype=jnp.float32):
    """z: (B, LATENT_DIM) float32 -> (B, 1, 28, 28) in `out_dtype`."""
    w1, b1, w2, b2, w3, b3 = padded_params
    B = z.shape[0]

    if tb is None:
        # Half the (rounded-up) batch so the grid has >= 2 steps -> the
        # "parallel" axis shards across both v7x TensorCores even at B <= 256;
        # cap at 512 rows (amortizes per-step overhead, fits VMEM on all gens).
        half = _round_up(B, 8) // 2
        tb = max(8, min(512, _round_up(half, 8)))
    Bp = _round_up(B, tb)

    # Pad batch to a tile multiple, latent 100 -> 128 lanes, and cast to bf16
    # at the DMA boundary (halves the z tile DMA, no in-kernel cast).
    z_pad = jnp.zeros((Bp, LATENT_PAD), jnp.bfloat16)
    z_pad = z_pad.at[:B, :LATENT_DIM].set(z.astype(jnp.bfloat16))

    flat = pl.pallas_call(
        generator_kernel,
        out_shape=jax.ShapeDtypeStruct((Bp, IMAGE_DIM), out_dtype),
        grid_spec=pl.GridSpec(
            grid=(Bp // tb,),
            in_specs=[
                pl.BlockSpec((tb, LATENT_PAD), lambda i: (i, 0)),       # z tile
                pl.BlockSpec((LATENT_PAD, HIDDEN_DIM), lambda i: (0, 0)),
                pl.BlockSpec((1, HIDDEN_DIM), lambda i: (0, 0)),
                pl.BlockSpec((HIDDEN_DIM, HIDDEN_DIM), lambda i: (0, 0)),
                pl.BlockSpec((1, HIDDEN_DIM), lambda i: (0, 0)),
                pl.BlockSpec((HIDDEN_DIM, IMAGE_DIM), lambda i: (0, 0)),
                pl.BlockSpec((1, IMAGE_DIM), lambda i: (0, 0)),
            ],
            out_specs=pl.BlockSpec((tb, IMAGE_DIM), lambda i: (i, 0)),
        ),
        compiler_params=pltpu.CompilerParams(
            dimension_semantics=("parallel",)),   # shards across TCs on v7x
    )(z_pad, w1, b1, w2, b2, w3, b3)

    # Leading-dim slice only (cheap / no-op when Bp == B); reshape is a bitcast.
    return flat[:B].reshape(B, 1, 28, 28)


def init_params(key):
    """Logical (unpadded, f32) parameters, weights stored as (in, out)."""
    k1, k2, k3 = jax.random.split(key, 3)
    scale = 0.02
    w1 = scale * jax.random.normal(k1, (LATENT_DIM, HIDDEN_DIM), jnp.float32)
    b1 = jnp.zeros((1, HIDDEN_DIM), jnp.float32)
    w2 = scale * jax.random.normal(k2, (HIDDEN_DIM, HIDDEN_DIM), jnp.float32)
    b2 = jnp.zeros((1, HIDDEN_DIM), jnp.float32)
    w3 = scale * jax.random.normal(k3, (HIDDEN_DIM, IMAGE_DIM), jnp.float32)
    b3 = jnp.zeros((1, IMAGE_DIM), jnp.float32)
    return (w1, b1, w2, b2, w3, b3)


if __name__ == "__main__":
    key = jax.random.PRNGKey(0)
    pkey, zkey = jax.random.split(key)

    params = init_params(pkey)
    padded_params = prepare_params(params)

    batch = 16
    z = jax.random.normal(zkey, (batch, LATENT_DIM), jnp.float32)

    fwd = jax.jit(generator_forward, static_argnames=("tb", "out_dtype"))
    # Auto tile picks tb=8 -> grid=(2,), exercising the batch-tiled pipeline
    # and the dual-TC path even at this small demo batch.
    img = fwd(z, padded_params)
    img = jax.block_until_ready(img)

    # sanity: shape + dtype + finite values + tanh range
    assert img.shape == (batch, 1, 28, 28), img.shape
    assert img.dtype == jnp.float32, img.dtype
    assert bool(jnp.all(jnp.isfinite(img)))
    assert bool(jnp.all(jnp.abs(img) <= 1.0))

    # cross-check against plain-JAX f32 reference (kernel uses bf16 weights and
    # bf16 z, f32 MXU accumulate -> loose tolerance)
    w1, b1, w2, b2, w3, b3 = params
    h = jnp.maximum(z @ w1 + b1, 0.0)
    h = jnp.maximum(h @ w2 + b2, 0.0)
    ref = jnp.tanh(h @ w3 + b3).reshape(batch, 1, 28, 28)
    err = float(jnp.max(jnp.abs(img - ref)))
    assert err < 2e-2, err

    print("KERNEL_OK")
</pallas_src>

<mosaic_0001>
module attributes {stable_mosaic.version = 11 : i64} {
  func.func @generator_kernel(%arg0: i32, %arg1: memref<8x128xbf16, #tpu.memory_space<vmem>>, %arg2: memref<128x256xbf16, #tpu.memory_space<vmem>>, %arg3: memref<1x256xf32, #tpu.memory_space<vmem>>, %arg4: memref<256x256xbf16, #tpu.memory_space<vmem>>, %arg5: memref<1x256xf32, #tpu.memory_space<vmem>>, %arg6: memref<256x784xbf16, #tpu.memory_space<vmem>>, %arg7: memref<1x784xf32, #tpu.memory_space<vmem>>, %arg8: memref<8x784xf32, #tpu.memory_space<vmem>>) attributes {dimension_semantics = [#tpu.dimension_semantics<parallel>], iteration_bounds = array<i64: 2>, scalar_prefetch = 0 : i64, scratch_operands = 0 : i64, tpu.core_type = #tpu.core_type<tc>, window_params = [{transform_indices = @transform_0, window_bounds = array<i64: 8, 128>}, {pipeline_mode = #tpu.pipeline_mode<synchronous>, transform_indices = @transform_1, window_bounds = array<i64: 128, 256>}, {pipeline_mode = #tpu.pipeline_mode<synchronous>, transform_indices = @transform_2, window_bounds = array<i64: 1, 256>}, {pipeline_mode = #tpu.pipeline_mode<synchronous>, transform_indices = @transform_3, window_bounds = array<i64: 256, 256>}, {pipeline_mode = #tpu.pipeline_mode<synchronous>, transform_indices = @transform_4, window_bounds = array<i64: 1, 256>}, {pipeline_mode = #tpu.pipeline_mode<synchronous>, transform_indices = @transform_5, window_bounds = array<i64: 256, 784>}, {pipeline_mode = #tpu.pipeline_mode<synchronous>, transform_indices = @transform_6, window_bounds = array<i64: 1, 784>}, {transform_indices = @transform_7, window_bounds = array<i64: 8, 784>}]} {
    %c0 = arith.constant 0 : index
    %c0_0 = arith.constant 0 : index
    %0 = vector.load %arg1[%c0, %c0_0] : memref<8x128xbf16, #tpu.memory_space<vmem>>, vector<8x128xbf16>
    %c0_1 = arith.constant 0 : index
    %c0_2 = arith.constant 0 : index
    %1 = vector.load %arg2[%c0_1, %c0_2] : memref<128x256xbf16, #tpu.memory_space<vmem>>, vector<128x256xbf16>
    %cst = arith.constant dense<0.000000e+00> : vector<8x256xf32>
    %2 = tpu.matmul %0, %1, %cst {dimension_numbers = #tpu.dot_dimension_numbers<[1], [0], [0], [1], [0, 0, 1, 1], [], []>} : vector<8x128xbf16>, vector<128x256xbf16>, vector<8x256xf32> -> vector<8x256xf32>
    %c0_3 = arith.constant 0 : index
    %c0_4 = arith.constant 0 : index
    %3 = vector.load %arg3[%c0_3, %c0_4] : memref<1x256xf32, #tpu.memory_space<vmem>>, vector<1x256xf32>
    %4 = vector.broadcast %3 : vector<1x256xf32> to vector<8x256xf32>
    %5 = arith.addf %2, %4 : vector<8x256xf32>
    %cst_5 = arith.constant 0.000000e+00 : f32
    %6 = vector.broadcast %cst_5 : f32 to vector<8x256xf32>
    %7 = arith.maximumf %5, %6 : vector<8x256xf32>
    %8 = arith.truncf %7 : vector<8x256xf32> to vector<8x256xbf16>
    %c0_6 = arith.constant 0 : index
    %c0_7 = arith.constant 0 : index
    %9 = vector.load %arg4[%c0_6, %c0_7] : memref<256x256xbf16, #tpu.memory_space<vmem>>, vector<256x256xbf16>
    %cst_8 = arith.constant dense<0.000000e+00> : vector<8x256xf32>
    %10 = tpu.matmul %8, %9, %cst_8 {dimension_numbers = #tpu.dot_dimension_numbers<[1], [0], [0], [1], [0, 0, 1, 1], [], []>} : vector<8x256xbf16>, vector<256x256xbf16>, vector<8x256xf32> -> vector<8x256xf32>
    %c0_9 = arith.constant 0 : index
    %c0_10 = arith.constant 0 : index
    %11 = vector.load %arg5[%c0_9, %c0_10] : memref<1x256xf32, #tpu.memory_space<vmem>>, vector<1x256xf32>
    %12 = vector.broadcast %11 : vector<1x256xf32> to vector<8x256xf32>
    %13 = arith.addf %10, %12 : vector<8x256xf32>
    %cst_11 = arith.constant 0.000000e+00 : f32
    %14 = vector.broadcast %cst_11 : f32 to vector<8x256xf32>
    %15 = arith.maximumf %13, %14 : vector<8x256xf32>
    %16 = arith.truncf %15 : vector<8x256xf32> to vector<8x256xbf16>
    %c0_12 = arith.constant 0 : index
    %c0_13 = arith.constant 0 : index
    %17 = vector.load %arg6[%c0_12, %c0_13] : memref<256x784xbf16, #tpu.memory_space<vmem>>, vector<256x784xbf16>
    %cst_14 = arith.constant dense<0.000000e+00> : vector<8x784xf32>
    %18 = tpu.matmul %16, %17, %cst_14 {dimension_numbers = #tpu.dot_dimension_numbers<[1], [0], [0], [1], [0, 0, 1, 1], [], []>} : vector<8x256xbf16>, vector<256x784xbf16>, vector<8x784xf32> -> vector<8x784xf32>
    %c0_15 = arith.constant 0 : index
    %c0_16 = arith.constant 0 : index
    %19 = vector.load %arg7[%c0_15, %c0_16] : memref<1x784xf32, #tpu.memory_space<vmem>>, vector<1x784xf32>
    %20 = vector.broadcast %19 : vector<1x784xf32> to vector<8x784xf32>
    %21 = arith.addf %18, %20 : vector<8x784xf32>
    %22 = math.tanh %21 : vector<8x784xf32>
    %c0_17 = arith.constant 0 : index
    %c0_18 = arith.constant 0 : index
    %23 = vector.load %arg8[%c0_17, %c0_18] : memref<8x784xf32, #tpu.memory_space<vmem>>, vector<8x784xf32>
    tpu.vector_store %arg8[%c0_17, %c0_18], %22 {strides = array<i32>} : memref<8x784xf32, #tpu.memory_space<vmem>>, vector<8x784xf32>,
    return
  }
  func.func @transform_0(%arg0: i32) -> (i32, i32) {
    %c0_i32 = arith.constant 0 : i32
    %c0_i32_0 = arith.constant 0 : i32
    return %arg0, %c0_i32 : i32, i32
  }
  func.func @transform_1(%arg0: i32) -> (i32, i32) {
    %c0_i32 = arith.constant 0 : i32
    %c0_i32_0 = arith.constant 0 : i32
    %c0_i32_1 = arith.constant 0 : i32
    return %c0_i32, %c0_i32_0 : i32, i32
  }
  func.func @transform_2(%arg0: i32) -> (i32, i32) {
    %c0_i32 = arith.constant 0 : i32
    %c0_i32_0 = arith.constant 0 : i32
    %c0_i32_1 = arith.constant 0 : i32
    return %c0_i32, %c0_i32_0 : i32, i32
  }
  func.func @transform_3(%arg0: i32) -> (i32, i32) {
    %c0_i32 = arith.constant 0 : i32
    %c0_i32_0 = arith.constant 0 : i32
    %c0_i32_1 = arith.constant 0 : i32
    return %c0_i32, %c0_i32_0 : i32, i32
  }
  func.func @transform_4(%arg0: i32) -> (i32, i32) {
    %c0_i32 = arith.constant 0 : i32
    %c0_i32_0 = arith.constant 0 : i32
    %c0_i32_1 = arith.constant 0 : i32
    return %c0_i32, %c0_i32_0 : i32, i32
  }
  func.func @transform_5(%arg0: i32) -> (i32, i32) {
    %c0_i32 = arith.constant 0 : i32
    %c0_i32_0 = arith.constant 0 : i32
    %c0_i32_1 = arith.constant 0 : i32
    return %c0_i32, %c0_i32_0 : i32, i32
  }
  func.func @transform_6(%arg0: i32) -> (i32, i32) {
    %c0_i32 = arith.constant 0 : i32
    %c0_i32_0 = arith.constant 0 : i32
    %c0_i32_1 = arith.constant 0 : i32
    return %c0_i32, %c0_i32_0 : i32, i32
  }
  func.func @transform_7(%arg0: i32) -> (i32, i32) {
    %c0_i32 = arith.constant 0 : i32
    %c0_i32_0 = arith.constant 0 : i32
    return %arg0, %c0_i32 : i32, i32
  }
}

</mosaic_0001>

<bundles_post_ra>
// kernel: generator_forward.1
= control target key start
LH: loop header
LB: loop body
LE: loop exit
PB: predicated region body
PF: predicated region fallthrough
CT: control target
= control target key end

     0   :  { %s2150_s24 = smov 0   ;;  %s2698_s0 = inlined_call_operand.vmem [shape: bf16[16,128], index: 0, kind: input, shape index: {}]   ;;  %s2699_s1 = inlined_call_operand.vmem [shape: bf16[128,256], index: 1, kind: input, shape index: {}]   ;;  %s2700_s2 = inlined_call_operand.vmem [shape: f32[1,256], index: 2, kind: input, shape index: {}]   ;;  %s2701_s3 = inlined_call_operand.vmem [shape: bf16[256,256], index: 3, kind: input, shape index: {}]   ;;  %s2702_s4 = inlined_call_operand.vmem [shape: f32[1,256], index: 4, kind: input, shape index: {}]   ;;  %s2703_s5 = inlined_call_operand.vmem [shape: bf16[256,784], index: 5, kind: input, shape index: {}]   ;;  %s2704_s6 = inlined_call_operand.vmem [shape: f32[1,784], index: 6, kind: input, shape index: {}]   ;;  %s2705_s7 = inlined_call_operand.vmem [shape: f32[16,784], index: 7, kind: output, shape index: {}]  }
   0x1 LB: > { %s1654_s25 = sadd.s32 4294967295, %s2107_s24   ;;  %p1658_p0 = scmp.ge.s32.totalorder %s2107_s24, 1  ;;  %s2107_s24 = sphi %s2150_s24, %s17_s24  }
   0x2   : > { %p236_p1 = scmp.lt.s32.totalorder %s2107_s24, 3 }
   0x4   : > { %p237_p2 = pnand %p1658_p0, %p236_p1 }
   0x5   : > { %v1855_v0 = vld [vmem:[%s2699_s1 + $0x4] ss:$8 sps:$4 sm:$0xff] (!%p237_p2)   ;;  %v1857_v1 = vld [vmem:[%s2699_s1] ss:$8 sps:$4 sm:$0xff] (!%p237_p2)   ;;  %v2109_v2 = vmov (!%p237_p2), 0   ;;  %p267_p3 = scmp.lt.s32.totalorder (!%p237_p2), %s1654_s25, 1 }
   0x6   : > { %240 = sbr.rel (%p237_p2) target bundleno = 769 (0x301), region = 48  ;;  %418 = vmatprep.mubr.bf16.mxu0 (!%p237_p2), %v2109_v2  ;;  %386 = vmatprep.subr.bf16.mxu0 (!%p237_p2), %v1855_v0  ;;  %v1858_v3 = vld [vmem:[%s2699_s1 + $0x14] ss:$8 sps:$4 sm:$0xff] (!%p237_p2)   ;;  %v1860_v4 = vld [vmem:[%s2699_s1 + $0x10] ss:$8 sps:$4 sm:$0xff] (!%p237_p2)   ;;  %vm1597_vm0 = vcmask (!%p237_p2), 130048  }
   0x7   : > { %387 = vmatpush1.bf16.msra.mxu0 (!%p237_p2), %v1857_v1  ;;  %v1861_v5 = vld [vmem:[%s2699_s1 + $0x24] ss:$8 sps:$4 sm:$0xff] (!%p237_p2)   ;;  %v1863_v6 = vld [vmem:[%s2699_s1 + $0x20] ss:$8 sps:$4 sm:$0xff] (!%p237_p2)   ;;  %v1864_v7 = vld [vmem:[%s2699_s1 + $0x34] ss:$8 sps:$4 sm:$0xff] (!%p237_p2)  }
   0x8   : > { %388 = vmatprep.subr.bf16.mxu0 (!%p237_p2), %v1858_v3  ;;  %v1866_v8 = vld [vmem:[%s2699_s1 + $0x30] ss:$8 sps:$4 sm:$0xff] (!%p237_p2)   ;;  %v1867_v9 = vld [vmem:[%s2699_s1 + $0x44] ss:$8 sps:$4 sm:$0xff] (!%p237_p2)   ;;  %v1881_v11 = vld [vmem:[%s2701_s3] ss:$8 sps:$4 sm:$0xff] (!%p237_p2)  }
   0x9   : > { %v1879_v10 = vld [vmem:[%s2701_s3 + $0x4] ss:$8 sps:$4 sm:$0xff] (!%p237_p2)   ;;  %v1882_v12 = vld [vmem:[%s2701_s3 + $0x14] ss:$8 sps:$4 sm:$0xff] (!%p237_p2)   ;;  %v1869_v13 = vld [vmem:[%s2699_s1 + $0x40] ss:$8 sps:$4 sm:$0xff] (!%p237_p2)  }
   0xa   : > { %635 = vmatprep.subr.bf16.mxu1 (!%p237_p2), %v1879_v10  ;;  %v1884_v14 = vld [vmem:[%s2701_s3 + $0x10] ss:$8 sps:$4 sm:$0xff] (!%p237_p2)   ;;  %v1885_v15 = vld [vmem:[%s2701_s3 + $0x24] ss:$8 sps:$4 sm:$0xff] (!%p237_p2)   ;;  %v1870_v16 = vld [vmem:[%s2699_s1 + $0x54] ss:$8 sps:$4 sm:$0xff] (!%p237_p2)  }
   0xb   : > { %389 = vmatpush1.bf16.msra.mxu0 (!%p237_p2), %v1860_v4  ;;  %636 = vmatpush1.bf16.msra.mxu1 (!%p237_p2), %v1881_v11  ;;  %v1872_v17 = vld [vmem:[%s2699_s1 + $0x50] ss:$8 sps:$4 sm:$0xff] (!%p237_p2)   ;;  %v1887_v18 = vld [vmem:[%s2701_s3 + $0x20] ss:$8 sps:$4 sm:$0xff] (!%p237_p2)   ;;  %v1888_v19 = vld [vmem:[%s2701_s3 + $0x34] ss:$8 sps:$4 sm:$0xff] (!%p237_p2)  }
   0xc   : > { %390 = vmatprep.subr.bf16.mxu0 (!%p237_p2), %v1861_v5  ;;  %637 = vmatprep.subr.bf16.mxu1 (!%p237_p2), %v1882_v12  ;;  %v1873_v20 = vld [vmem:[%s2699_s1 + $0x64] ss:$8 sps:$4 sm:$0xff] (!%p237_p2)   ;;  %v1875_v21 = vld [vmem:[%s2699_s1 + $0x60] ss:$8 sps:$4 sm:$0xff] (!%p237_p2)   ;;  %v1890_v22 = vld [vmem:[%s2701_s3 + $0x30] ss:$8 sps:$4 sm:$0xff] (!%p237_p2)  }
   0xd   : > { %s2707_s25 = smov (!%p267_p3, %s1654_s25), 1  ;;  %v1891_v23 = vld [vmem:[%s2701_s3 + $0x44] ss:$8 sps:$4 sm:$0xff]   ;;  %v1876_v24 = vld [vmem:[%s2699_s1 + $0x74] ss:$8 sps:$4 sm:$0xff]  }
   0xe   : > { %s1659_s28 = sshll.u32 %s2707_s25, 2  ;;  %v1878_v25 = vld [vmem:[%s2699_s1 + $0x70] ss:$8 sps:$4 sm:$0xff]   ;;  %v1893_v26 = vld [vmem:[%s2701_s3 + $0x40] ss:$8 sps:$4 sm:$0xff]   ;;  %s1845_s18 = smul.u32 56, %s2707_s25 }
   0xf   : > { %391 = vmatpush1.bf16.msra.mxu0 %v1863_v6  ;;  %638 = vmatpush1.bf16.msra.mxu1 %v1884_v14  ;;  %s270_s14 = scalar_lea.vmem %s2698_s0, %s1659_s28  ;;  %v1894_v27 = vld [vmem:[%s2701_s3 + $0x54] ss:$8 sps:$4 sm:$0xff]   ;;  %v1896_v29 = vld [vmem:[%s2701_s3 + $0x50] ss:$8 sps:$4 sm:$0xff]   ;;  %v1897_v30 = vld [vmem:[%s2701_s3 + $0x64] ss:$8 sps:$4 sm:$0xff]  }
  0x10   : > { %392 = vmatprep.subr.bf16.mxu0 %v1864_v7  ;;  %639 = vmatprep.subr.bf16.mxu1 %v1885_v15  ;;  %v277_v28 = vld [vmem:[%s270_s14] sm:$0xf]  ;;  %v1900_v32 = vld [vmem:[%s2701_s3 + $0x74] ss:$8 sps:$4 sm:$0xff]   ;;  %v1902_v33 = vld [vmem:[%s2701_s3 + $0x70] ss:$8 sps:$4 sm:$0xff]   ;;  %v296_v15 = vlaneseq  ;;  %s2683_s21 = scalar_lea.vmem %s2705_s7, %s1845_s18 }
  0x11   : > { %v1899_v31 = vld [vmem:[%s2701_s3 + $0x60] ss:$8 sps:$4 sm:$0xff]   ;;  %v1903_v34 = vld [vmem:[%s2701_s3 + $0x84] ss:$8 sps:$4 sm:$0xff]   ;;  %v1906_v36 = vld [vmem:[%s2701_s3 + $0x94] ss:$8 sps:$4 sm:$0xff]  }
  0x12   : > { %v1905_v35 = vld [vmem:[%s2701_s3 + $0x80] ss:$8 sps:$4 sm:$0xff]   ;;  %v1908_v37 = vld [vmem:[%s2701_s3 + $0x90] ss:$8 sps:$4 sm:$0xff]   ;;  %v1909_v38 = vld [vmem:[%s2701_s3 + $0xa4] ss:$8 sps:$4 sm:$0xff]  }
  0x13   : > { %393 = vmatpush1.bf16.msra.mxu0 %v1866_v8  ;;  %640 = vmatpush1.bf16.msra.mxu1 %v1887_v18  ;;  %v1911_v39 = vld [vmem:[%s2701_s3 + $0xa0] ss:$8 sps:$4 sm:$0xff]   ;;  %v1912_v40 = vld [vmem:[%s2701_s3 + $0xb4] ss:$8 sps:$4 sm:$0xff]   ;;  %v1914_v41 = vld [vmem:[%s2701_s3 + $0xb0] ss:$8 sps:$4 sm:$0xff]  }
  0x14   : > { %394 = vmatprep.subr.bf16.mxu0 %v1867_v9  ;;  %641 = vmatprep.subr.bf16.mxu1 %v1888_v19  ;;  %v1915_v42 = vld [vmem:[%s2701_s3 + $0xc4] ss:$8 sps:$4 sm:$0xff]   ;;  %v1917_v43 = vld [vmem:[%s2701_s3 + $0xc0] ss:$8 sps:$4 sm:$0xff]   ;;  %v1918_v44 = vld [vmem:[%s2701_s3 + $0xd4] ss:$8 sps:$4 sm:$0xff]  }
  0x15   : > { %v1920_v45 = vld [vmem:[%s2701_s3 + $0xd0] ss:$8 sps:$4 sm:$0xff]   ;;  %v1921_v46 = vld [vmem:[%s2701_s3 + $0xe4] ss:$8 sps:$4 sm:$0xff]   ;;  %v1923_v47 = vld [vmem:[%s2701_s3 + $0xe0] ss:$8 sps:$4 sm:$0xff]  }
  0x16   : > { %v1924_v48 = vld [vmem:[%s2701_s3 + $0xf4] ss:$8 sps:$4 sm:$0xff]   ;;  %v1926_v49 = vld [vmem:[%s2701_s3 + $0xf0] ss:$8 sps:$4 sm:$0xff]   ;;  %v1929_v51 = vld [vmem:[%s2703_s5 + $0x4] ss:$28 sps:$4 sm:$0xff]  }
  0x17   : > { %395 = vmatpush1.bf16.msra.mxu0 %v1869_v13  ;;  %642 = vmatpush1.bf16.msra.mxu1 %v1890_v22  ;;  %v1927_v50 = vld [vmem:[%s2703_s5] ss:$28 sps:$4 sm:$0xff]   ;;  %v1932_v52 = vld [vmem:[%s2703_s5 + $0xc] ss:$28 sps:$4 sm:$0xff]   ;;  %v1933_v54 = vld [vmem:[%s2703_s5 + $0x38] ss:$28 sps:$4 sm:$0xff]  }
  0x18   : > { %396 = vmatprep.subr.bf16.mxu0 %v1870_v16  ;;  %643 = vmatprep.subr.bf16.mxu1 %v1891_v23  ;;  %v1935_v53 = vld [vmem:[%s2703_s5 + $0x3c] ss:$28 sps:$4 sm:$0xff]   ;;  %v1941_v55 = vld [vmem:[%s2703_s5 + $0x74] ss:$28 sps:$4 sm:$0xff]   ;;  %v1947_v57 = vld [vmem:[%s2703_s5 + $0xac] ss:$28 sps:$4 sm:$0xff]  }
  0x19   : > { %v1939_v56 = vld [vmem:[%s2703_s5 + $0x70] ss:$28 sps:$4 sm:$0xff]   ;;  %v1945_v58 = vld [vmem:[%s2703_s5 + $0xa8] ss:$28 sps:$4 sm:$0xff]   ;;  %v1951_v60 = vld [vmem:[%s2703_s5 + $0xe0] ss:$28 sps:$4 sm:$0xff]  }
  0x1a   : > { %v1953_v59 = vld [vmem:[%s2703_s5 + $0xe4] ss:$28 sps:$4 sm:$0xff]   ;;  %v1959_v61 = vld [vmem:[%s2703_s5 + $0x11c] ss:$28 sps:$4 sm:$0xff]   ;;  %v1965_v63 = vld [vmem:[%s2703_s5 + $0x154] ss:$28 sps:$4 sm:$0xff]  }
  0x1b   : > { %397 = vmatpush1.bf16.msra.mxu0 %v1872_v17  ;;  %644 = vmatpush1.bf16.msra.mxu1 %v1893_v26  ;;  %v1957_v62 = vld [vmem:[%s2703_s5 + $0x118] ss:$28 sps:$4 sm:$0xff]   ;;  %v1963_v0 = vld [vmem:[%s2703_s5 + $0x150] ss:$28 sps:$4 sm:$0xff]   ;;  %v1969_v2 = vld [vmem:[%s2703_s5 + $0x188] ss:$28 sps:$4 sm:$0xff]  }
  0x1c   : > { %398 = vmatprep.subr.bf16.mxu0 %v1873_v20  ;;  %645 = vmatprep.subr.bf16.mxu1 %v1894_v27  ;;  %v1971_v1 = vld [vmem:[%s2703_s5 + $0x18c] ss:$28 sps:$4 sm:$0xff]   ;;  %v1977_v3 = vld [vmem:[%s2703_s5 + $0x1c4] ss:$28 sps:$4 sm:$0xff]   ;;  %v1983_v5 = vld [vmem:[%s2703_s5 + $0x1fc] ss:$28 sps:$4 sm:$0xff]  }
  0x1d   : > { %v1975_v4 = vld [vmem:[%s2703_s5 + $0x1c0] ss:$28 sps:$4 sm:$0xff]   ;;  %v1981_v6 = vld [vmem:[%s2703_s5 + $0x1f8] ss:$28 sps:$4 sm:$0xff]   ;;  %v1987_v8 = vld [vmem:[%s2703_s5 + $0x230] ss:$28 sps:$4 sm:$0xff]  }
  0x1e   : > { %v1989_v7 = vld [vmem:[%s2703_s5 + $0x234] ss:$28 sps:$4 sm:$0xff]   ;;  %v1995_v9 = vld [vmem:[%s2703_s5 + $0x26c] ss:$28 sps:$4 sm:$0xff]   ;;  %v2001_v11 = vld [vmem:[%s2703_s5 + $0x2a4] ss:$28 sps:$4 sm:$0xff]  }
  0x1f   : > { %399 = vmatpush1.bf16.msra.mxu0 %v1875_v21  ;;  %646 = vmatpush1.bf16.msra.mxu1 %v1896_v29  ;;  %v1993_v10 = vld [vmem:[%s2703_s5 + $0x268] ss:$28 sps:$4 sm:$0xff]   ;;  %v1999_v12 = vld [vmem:[%s2703_s5 + $0x2a0] ss:$28 sps:$4 sm:$0xff]   ;;  %v2005_v14 = vld [vmem:[%s2703_s5 + $0x2d8] ss:$28 sps:$4 sm:$0xff]  }
  0x20   : > { %400 = vmatprep.subr.bf16.mxu0 %v1876_v24  ;;  %647 = vmatprep.subr.bf16.mxu1 %v1897_v30  ;;  %v2007_v13 = vld [vmem:[%s2703_s5 + $0x2dc] ss:$28 sps:$4 sm:$0xff]   ;;  %v2399_v16 = vshrl.u32 %v296_v15, 7  ;;  %v294_v18 = vld [vmem:[%s2700_s2] sm:$0x3] }
  0x22   : > { %v2402_v17 = vsub.s32 0, %v2399_v16  ;;  %v2408_v19 = vsub.s32 1, %v2399_v16 }
  0x23   : > { %401 = vmatpush1.bf16.msra.mxu0 %v1878_v25  ;;  %648 = vmatpush1.bf16.msra.mxu1 %v1899_v31  ;;  %v1930_v31 = vld [vmem:[%s2703_s5 + $0x8] ss:$28 sps:$4 sm:$0xff]  }
  0x24   : > { %649 = vmatprep.subr.bf16.mxu1 %v1900_v32  ;;  %1421 = vmatprep.subr.bf16.mxu0 %v1929_v51  ;;  %v299_v20 = vrot.slane %v294_v18, %v2402_v17  ;;  %v303_v21 = vrot.slane %v294_v18, %v2408_v19  ;;  %v1992_v51 = vld [vmem:[%s2703_s5 + $0x23c] ss:$28 sps:$4 sm:$0xff]  }
  0x26   : > { %419 = vmatmul.mubr.bf16.vlgmr.msra.gmra.mrb[0].mxu0 %v277_v28 }
  0x27   : > { %650 = vmatpush1.bf16.msra.mxu1 %v1902_v33  ;;  %1422 = vmatpush1.bf16.msra.mxu0 %v1927_v50  ;;  %v1938_v33 = vld [vmem:[%s2703_s5 + $0x44] ss:$28 sps:$4 sm:$0xff]  }
  0x28   : > { %651 = vmatprep.subr.bf16.mxu1 %v1903_v34  ;;  %1423 = vmatprep.subr.bf16.mxu0 %v1935_v53  ;;  %v1936_v34 = vld [vmem:[%s2703_s5 + $0x40] ss:$28 sps:$4 sm:$0xff]   ;;  %v1998_v53 = vld [vmem:[%s2703_s5 + $0x274] ss:$28 sps:$4 sm:$0xff]  }
  0x29   : > { %v1984_v50 = vld [vmem:[%s2703_s5 + $0x200] ss:$28 sps:$4 sm:$0xff]  }
  0x2b   : > { %652 = vmatpush1.bf16.msra.mxu1 %v1905_v35  ;;  %1424 = vmatpush1.bf16.msra.mxu0 %v1933_v54  ;;  %v1944_v35 = vld [vmem:[%s2703_s5 + $0x7c] ss:$28 sps:$4 sm:$0xff]   ;;  %v1996_v54 = vld [vmem:[%s2703_s5 + $0x270] ss:$28 sps:$4 sm:$0xff]  }
  0x2c   : > { %653 = vmatprep.subr.bf16.mxu1 %v1906_v36  ;;  %1425 = vmatprep.subr.bf16.mxu0 %v1941_v55  ;;  %v1942_v36 = vld [vmem:[%s2703_s5 + $0x78] ss:$28 sps:$4 sm:$0xff]   ;;  %v2004_v55 = vld [vmem:[%s2703_s5 + $0x2ac] ss:$28 sps:$4 sm:$0xff]  }
  0x2f   : > { %654 = vmatpush1.bf16.msra.mxu1 %v1908_v37  ;;  %1426 = vmatpush1.bf16.msra.mxu0 %v1939_v56  ;;  %v1950_v37 = vld [vmem:[%s2703_s5 + $0xb4] ss:$28 sps:$4 sm:$0xff]   ;;  %v2002_v56 = vld [vmem:[%s2703_s5 + $0x2a8] ss:$28 sps:$4 sm:$0xff]  }
  0x30   : > { %655 = vmatprep.subr.bf16.mxu1 %v1909_v38  ;;  %1427 = vmatprep.subr.bf16.mxu0 %v1947_v57  ;;  %v1948_v38 = vld [vmem:[%s2703_s5 + $0xb0] ss:$28 sps:$4 sm:$0xff]   ;;  %v2010_v57 = vld [vmem:[%s2703_s5 + $0x2e4] ss:$28 sps:$4 sm:$0xff]  }
  0x33   : > { %656 = vmatpush1.bf16.msra.mxu1 %v1911_v39  ;;  %1428 = vmatpush1.bf16.msra.mxu0 %v1945_v58  ;;  %v1956_v39 = vld [vmem:[%s2703_s5 + $0xec] ss:$28 sps:$4 sm:$0xff]   ;;  %v2008_v58 = vld [vmem:[%s2703_s5 + $0x2e0] ss:$28 sps:$4 sm:$0xff]  }
  0x34   : > { %657 = vmatprep.subr.bf16.mxu1 %v1912_v40  ;;  %1429 = vmatprep.subr.bf16.mxu0 %v1953_v59  ;;  %v1954_v40 = vld [vmem:[%s2703_s5 + $0xe8] ss:$28 sps:$4 sm:$0xff]   ;;  %v2013_v59 = vld [vmem:[%s2703_s5 + $0x314] ss:$28 sps:$4 sm:$0xff]  }
  0x37   : > { %658 = vmatpush1.bf16.msra.mxu1 %v1914_v41  ;;  %1430 = vmatpush1.bf16.msra.mxu0 %v1951_v60  ;;  %v1962_v41 = vld [vmem:[%s2703_s5 + $0x124] ss:$28 sps:$4 sm:$0xff]   ;;  %v2016_v60 = vld [vmem:[%s2703_s5 + $0x31c] ss:$28 sps:$4 sm:$0xff]  }
  0x38   : > { %659 = vmatprep.subr.bf16.mxu1 %v1915_v42  ;;  %1431 = vmatprep.subr.bf16.mxu0 %v1959_v61  ;;  %v1960_v42 = vld [vmem:[%s2703_s5 + $0x120] ss:$28 sps:$4 sm:$0xff]   ;;  %v2011_v61 = vld [vmem:[%s2703_s5 + $0x310] ss:$28 sps:$4 sm:$0xff]  }
  0x3b   : > { %660 = vmatpush1.bf16.msra.mxu1 %v1917_v43  ;;  %1432 = vmatpush1.bf16.msra.mxu0 %v1957_v62  ;;  %v1968_v43 = vld [vmem:[%s2703_s5 + $0x15c] ss:$28 sps:$4 sm:$0xff]  }
  0x3c   : > { %661 = vmatprep.subr.bf16.mxu1 %v1918_v44  ;;  %1433 = vmatprep.subr.bf16.mxu0 %v1965_v63  ;;  %v1966_v44 = vld [vmem:[%s2703_s5 + $0x158] ss:$28 sps:$4 sm:$0xff]   ;;  %v2019_v63 = vld [vmem:[%s2703_s5 + $0x34c] ss:$28 sps:$4 sm:$0xff]  }
  0x3d   : > { %v2014_v62 = vld [vmem:[%s2703_s5 + $0x318] ss:$28 sps:$4 sm:$0xff]  }
  0x3f   : > { %662 = vmatpush1.bf16.msra.mxu1 %v1920_v45  ;;  %1434 = vmatpush1.bf16.msra.mxu0 %v1963_v0  ;;  %v1974_v45 = vld [vmem:[%s2703_s5 + $0x194] ss:$28 sps:$4 sm:$0xff]  }
  0x40   : > { %663 = vmatprep.subr.bf16.mxu1 %v1921_v46  ;;  %1435 = vmatprep.subr.bf16.mxu0 %v1971_v1  ;;  %v1972_v46 = vld [vmem:[%s2703_s5 + $0x190] ss:$28 sps:$4 sm:$0xff]   ;;  %v2017_v1 = vld [vmem:[%s2703_s5 + $0x348] ss:$28 sps:$4 sm:$0xff]  }
  0x41   : > { %v2022_v0 = vld [vmem:[%s2703_s5 + $0x354] ss:$28 sps:$4 sm:$0xff]  }
  0x43   : > { %664 = vmatpush1.bf16.msra.mxu1 %v1923_v47  ;;  %1436 = vmatpush1.bf16.msra.mxu0 %v1969_v2  ;;  %v1980_v47 = vld [vmem:[%s2703_s5 + $0x1cc] ss:$28 sps:$4 sm:$0xff]  }
  0x44   : > { %665 = vmatprep.subr.bf16.mxu1 %v1924_v48  ;;  %1437 = vmatprep.subr.bf16.mxu0 %v1977_v3  ;;  %v1978_v48 = vld [vmem:[%s2703_s5 + $0x1c8] ss:$28 sps:$4 sm:$0xff]   ;;  %v2020_v2 = vld [vmem:[%s2703_s5 + $0x350] ss:$28 sps:$4 sm:$0xff]  }
  0x45   : > { %v2025_v3 = vld [vmem:[%s2703_s5 + $0x14] ss:$28 sps:$4 sm:$0xff]  }
  0x47   : > { %666 = vmatpush1.bf16.msra.mxu1 %v1926_v49  ;;  %1438 = vmatpush1.bf16.msra.mxu0 %v1975_v4  ;;  %v1986_v49 = vld [vmem:[%s2703_s5 + $0x204] ss:$28 sps:$4 sm:$0xff]   ;;  %v2026_v4 = vld [vmem:[%s2703_s5 + $0x1d8] ss:$28 sps:$4 sm:$0xff]  }
  0x48   : > { %1462 = vmatprep.subr.bf16.mxu1 %v1932_v52  ;;  %1439 = vmatprep.subr.bf16.mxu0 %v1983_v5  ;;  %v1990_v52 = vld [vmem:[%s2703_s5 + $0x238] ss:$28 sps:$4 sm:$0xff]   ;;  %v463_v5 = vld [vmem:[%s2702_s4] sm:$0x3] }
  0x4b   : > { %1440 = vmatpush1.bf16.msra.mxu0 %v1981_v6  ;;  %v468_v6 = vrot.slane %v463_v5, %v2402_v17 }
  0x4c   : > { %1441 = vmatprep.subr.bf16.mxu0 %v1989_v7  ;;  %v472_v7 = vrot.slane %v463_v5, %v2408_v19  ;;  %v824_v5 = vsub.s32 3, %v2399_v16 }
  0x4f   : > { %1442 = vmatpush1.bf16.msra.mxu0 %v1987_v8 }
  0x50   : > { %1443 = vmatprep.subr.bf16.mxu0 %v1995_v9 }
  0x53   : > { %1444 = vmatpush1.bf16.msra.mxu0 %v1993_v10 }
  0x54   : > { %1445 = vmatprep.subr.bf16.mxu0 %v2001_v11 }
  0x57   : > { %1446 = vmatpush1.bf16.msra.mxu0 %v1999_v12 }
  0x58   : > { %1447 = vmatprep.subr.bf16.mxu0 %v2007_v13 }
  0x5b   : > { %1448 = vmatpush1.bf16.msra.mxu0 %v2005_v14 }
  0x5c   : > { %1449 = vmatprep.subr.bf16.mxu0 %v2013_v59  ;;  %v2077_v59 = vld [vmem:[%s2703_s5 + $0x2b4] ss:$28 sps:$4 sm:$0xff]  }
  0x5f   : > { %1450 = vmatpush1.bf16.msra.mxu0 %v2011_v61  ;;  %v2080_v61 = vld [vmem:[%s2703_s5 + $0x2ec] ss:$28 sps:$4 sm:$0xff]  }
  0x60   : > { %1451 = vmatprep.subr.bf16.mxu0 %v2019_v63  ;;  %v2083_v63 = vld [vmem:[%s2703_s5 + $0x324] ss:$28 sps:$4 sm:$0xff]  }
  0x63   : > { %1452 = vmatpush1.bf16.msra.mxu0 %v2017_v1  ;;  %v2086_v1 = vld [vmem:[%s2703_s5 + $0x35c] ss:$28 sps:$4 sm:$0xff]  }
  0x64   : > { %1503 = vmatprep.subr.bf16.mxu0 %v2025_v3  ;;  %v820_v3 = vsub.s32 2, %v2399_v16 }
  0xf9   : > { %v420_v22 = vpop.f32.mrb[0].mxu0 }
  0xfa   : > { %v421_v23 = vadd.f32 %v420_v22, %v299_v20  ;;  %v422_v24 = vpop.f32.mrb[1].mxu0  ;;  %v2023_v20 = vld [vmem:[%s2703_s5 + $0x10] ss:$28 sps:$4 sm:$0xff]  }
  0xfb   : > { %v423_v25 = vadd.f32 %v422_v24, %v303_v21  ;;  %v424_v26 = vpop.f32.mrb[2].mxu0  ;;  %v2027_v21 = vld [vmem:[%s2703_s5 + $0x18] ss:$28 sps:$4 sm:$0xff]   ;;  %v2031_v24 = vld [vmem:[%s2703_s5 + $0x210] ss:$28 sps:$4 sm:$0xff]  }
  0xfc   : > { %v427_v27 = vmax.f32 %v421_v23, 0.0  ;;  %v425_v28 = vpop.f32.mrb[3].mxu0  ;;  %v2030_v23 = vld [vmem:[%s2703_s5 + $0x4c] ss:$28 sps:$4 sm:$0xff]  }
  0xfd   : > { %v428_v29 = vmax.f32 %v423_v25, 0.0  ;;  %v2028_v25 = vld [vmem:[%s2703_s5 + $0x48] ss:$28 sps:$4 sm:$0xff]   ;;  %v2032_v26 = vld [vmem:[%s2703_s5 + $0x50] ss:$28 sps:$4 sm:$0xff]  }
  0xfe   : > { %v429_v32 = vpack.c.bf16 %v427_v27, %v427_v27  ;;  %v2035_v27 = vld [vmem:[%s2703_s5 + $0x84] ss:$28 sps:$4 sm:$0xff]  }
  0xff   : > { %v430_v30 = vpack.c.bf16 %v428_v29, %v428_v29  ;;  %v2036_v28 = vld [vmem:[%s2703_s5 + $0x248] ss:$28 sps:$4 sm:$0xff]   ;;  %v2033_v29 = vld [vmem:[%s2703_s5 + $0x80] ss:$28 sps:$4 sm:$0xff]  }
 0x101   : > { %667 = vmatprep.mubr.bf16.mxu1 %v430_v30  ;;  %v2037_v30 = vld [vmem:[%s2703_s5 + $0x88] ss:$28 sps:$4 sm:$0xff]  }
 0x102   : > { %668 = vmatmul.mubr.bf16.vlgmr.msra.gmra.mrb[0].mxu1 %v429_v32  ;;  %v2041_v32 = vld [vmem:[%s2703_s5 + $0x280] ss:$28 sps:$4 sm:$0xff]  }
 0x103   : > { %1463 = vmatpush1.bf16.msra.mxu1 %v1930_v31  ;;  %v2040_v31 = vld [vmem:[%s2703_s5 + $0xbc] ss:$28 sps:$4 sm:$0xff]  }
 0x104   : > { %1464 = vmatprep.subr.bf16.mxu1 %v1938_v33  ;;  %v2038_v33 = vld [vmem:[%s2703_s5 + $0xb8] ss:$28 sps:$4 sm:$0xff]  }
 0x107   : > { %1465 = vmatpush1.bf16.msra.mxu1 %v1936_v34  ;;  %v2042_v34 = vld [vmem:[%s2703_s5 + $0xc0] ss:$28 sps:$4 sm:$0xff]  }
 0x108   : > { %1466 = vmatprep.subr.bf16.mxu1 %v1944_v35  ;;  %v2045_v35 = vld [vmem:[%s2703_s5 + $0xf4] ss:$28 sps:$4 sm:$0xff]  }
 0x10b   : > { %1467 = vmatpush1.bf16.msra.mxu1 %v1942_v36  ;;  %v2046_v36 = vld [vmem:[%s2703_s5 + $0x2b8] ss:$28 sps:$4 sm:$0xff]  }
 0x10c   : > { %1468 = vmatprep.subr.bf16.mxu1 %v1950_v37  ;;  %v2043_v37 = vld [vmem:[%s2703_s5 + $0xf0] ss:$28 sps:$4 sm:$0xff]  }
 0x10f   : > { %1469 = vmatpush1.bf16.msra.mxu1 %v1948_v38  ;;  %v2047_v38 = vld [vmem:[%s2703_s5 + $0xf8] ss:$28 sps:$4 sm:$0xff]  }
 0x110   : > { %1470 = vmatprep.subr.bf16.mxu1 %v1956_v39  ;;  %v2050_v39 = vld [vmem:[%s2703_s5 + $0x12c] ss:$28 sps:$4 sm:$0xff]  }
 0x113   : > { %1471 = vmatpush1.bf16.msra.mxu1 %v1954_v40  ;;  %v2051_v40 = vld [vmem:[%s2703_s5 + $0x2f0] ss:$28 sps:$4 sm:$0xff]  }
 0x114   : > { %1472 = vmatprep.subr.bf16.mxu1 %v1962_v41  ;;  %v2048_v41 = vld [vmem:[%s2703_s5 + $0x128] ss:$28 sps:$4 sm:$0xff]  }
 0x117   : > { %1473 = vmatpush1.bf16.msra.mxu1 %v1960_v42  ;;  %v2052_v42 = vld [vmem:[%s2703_s5 + $0x130] ss:$28 sps:$4 sm:$0xff]  }
 0x118   : > { %1474 = vmatprep.subr.bf16.mxu1 %v1968_v43  ;;  %v2055_v43 = vld [vmem:[%s2703_s5 + $0x164] ss:$28 sps:$4 sm:$0xff]  }
 0x11b   : > { %1475 = vmatpush1.bf16.msra.mxu1 %v1966_v44  ;;  %v2056_v44 = vld [vmem:[%s2703_s5 + $0x328] ss:$28 sps:$4 sm:$0xff]  }
 0x11c   : > { %1476 = vmatprep.subr.bf16.mxu1 %v1974_v45  ;;  %v2053_v45 = vld [vmem:[%s2703_s5 + $0x160] ss:$28 sps:$4 sm:$0xff]  }
 0x11f   : > { %1477 = vmatpush1.bf16.msra.mxu1 %v1972_v46  ;;  %v2057_v46 = vld [vmem:[%s2703_s5 + $0x168] ss:$28 sps:$4 sm:$0xff]  }
 0x120   : > { %1478 = vmatprep.subr.bf16.mxu1 %v1980_v47  ;;  %v2060_v47 = vld [vmem:[%s2703_s5 + $0x19c] ss:$28 sps:$4 sm:$0xff]  }
 0x123   : > { %1479 = vmatpush1.bf16.msra.mxu1 %v1978_v48  ;;  %v2061_v48 = vld [vmem:[%s2703_s5 + $0x360] ss:$28 sps:$4 sm:$0xff]  }
 0x124   : > { %1480 = vmatprep.subr.bf16.mxu1 %v1986_v49  ;;  %v2058_v49 = vld [vmem:[%s2703_s5 + $0x198] ss:$28 sps:$4 sm:$0xff]  }
 0x127   : > { %1481 = vmatpush1.bf16.msra.mxu1 %v1984_v50  ;;  %v2062_v50 = vld [vmem:[%s2703_s5 + $0x1a0] ss:$28 sps:$4 sm:$0xff]  }
 0x128   : > { %1482 = vmatprep.subr.bf16.mxu1 %v1992_v51  ;;  %v2065_v51 = vld [vmem:[%s2703_s5 + $0x1d4] ss:$28 sps:$4 sm:$0xff]  }
 0x12b   : > { %1483 = vmatpush1.bf16.msra.mxu1 %v1990_v52  ;;  %v2063_v52 = vld [vmem:[%s2703_s5 + $0x1d0] ss:$28 sps:$4 sm:$0xff]  }
 0x12c   : > { %1484 = vmatprep.subr.bf16.mxu1 %v1998_v53  ;;  %v2068_v53 = vld [vmem:[%s2703_s5 + $0x20c] ss:$28 sps:$4 sm:$0xff]  }
 0x12f   : > { %1485 = vmatpush1.bf16.msra.mxu1 %v1996_v54  ;;  %v2066_v54 = vld [vmem:[%s2703_s5 + $0x208] ss:$28 sps:$4 sm:$0xff]  }
 0x130   : > { %1486 = vmatprep.subr.bf16.mxu1 %v2004_v55  ;;  %v2071_v55 = vld [vmem:[%s2703_s5 + $0x244] ss:$28 sps:$4 sm:$0xff]  }
 0x133   : > { %1487 = vmatpush1.bf16.msra.mxu1 %v2002_v56  ;;  %v2069_v56 = vld [vmem:[%s2703_s5 + $0x240] ss:$28 sps:$4 sm:$0xff]  }
 0x134   : > { %1488 = vmatprep.subr.bf16.mxu1 %v2010_v57  ;;  %v2074_v57 = vld [vmem:[%s2703_s5 + $0x27c] ss:$28 sps:$4 sm:$0xff]  }
 0x137   : > { %1489 = vmatpush1.bf16.msra.mxu1 %v2008_v58  ;;  %v2072_v58 = vld [vmem:[%s2703_s5 + $0x278] ss:$28 sps:$4 sm:$0xff]  }
 0x138   : > { %1490 = vmatprep.subr.bf16.mxu1 %v2016_v60  ;;  %v2075_v60 = vld [vmem:[%s2703_s5 + $0x2b0] ss:$28 sps:$4 sm:$0xff]  }
 0x13b   : > { %1491 = vmatpush1.bf16.msra.mxu1 %v2014_v62  ;;  %v2078_v62 = vld [vmem:[%s2703_s5 + $0x2e8] ss:$28 sps:$4 sm:$0xff]  }
 0x13c   : > { %1492 = vmatprep.subr.bf16.mxu1 %v2022_v0  ;;  %v2081_v0 = vld [vmem:[%s2703_s5 + $0x320] ss:$28 sps:$4 sm:$0xff]  }
 0x13f   : > { %1493 = vmatpush1.bf16.msra.mxu1 %v2020_v2  ;;  %v2084_v2 = vld [vmem:[%s2703_s5 + $0x358] ss:$28 sps:$4 sm:$0xff]  }
 0x140   : > { %1823 = vmatprep.subr.bf16.mxu1 %v2026_v4  ;;  %v808_v4 = vld [vmem:[%s2704_s6] sm:$0x7f] }
 0x1d5   : > { %v669_v8 = vpop.f32.mrb[0].mxu1 }
 0x1d6   : > { %v670_v9 = vadd.f32 %v669_v8, %v468_v6  ;;  %v671_v10 = vpop.f32.mrb[1].mxu1  ;;  %v813_v6 = vrot.slane %v808_v4, %v2402_v17  ;;  %v817_v8 = vrot.slane %v808_v4, %v2408_v19 }
 0x1d7   : > { %v672_v11 = vadd.f32 %v671_v10, %v472_v7  ;;  %v673_v12 = vpop.f32.mrb[2].mxu1  ;;  %v821_v7 = vrot.slane %v808_v4, %v820_v3 }
 0x1d8   : > { %v676_v13 = vmax.f32 %v670_v9, 0.0  ;;  %v674_v14 = vpop.f32.mrb[3].mxu1  ;;  %v825_v9 = vrot.slane %v808_v4, %v824_v5 }
 0x1d9   : > { %v677_v15 = vmax.f32 %v672_v11, 0.0 }
 0x1da   : > { %v2534_v22 = vpack.c.bf16 %v676_v13, %v676_v13 }
 0x1db   : > { %v679_v18 = vpack.c.bf16 %v677_v15, %v677_v15 }
 0x1dd   : > { %1453 = vmatprep.mubr.bf16.mxu0 %v679_v18  ;;  %1494 = vmatprep.mubr.bf16.mxu1 %v679_v18 }
 0x1de   : > { %1454 = vmatmul.mubr.bf16.vlgmr.msra.gmra.mrb[4].mxu0 %v2534_v22  ;;  %1495 = vmatmul.mubr.bf16.vlgmr.msra.gmra.mrb[4].mxu1 %v2534_v22 }
 0x1df   : > { %1504 = vmatpush1.bf16.msra.mxu0 %v2023_v20  ;;  %1824 = vmatpush3.bf16.msra.mxu1 %v2027_v21 }
 0x1e0   : > { %1535 = vmatprep.mubr.bf16.mxu0 %v679_v18  ;;  %1576 = vmatprep.mubr.bf16.mxu1 %v679_v18 }
 0x1e1   : > { %1505 = vmatprep.subr.bf16.mxu0 %v2030_v23  ;;  %1825 = vmatprep.subr.bf16.mxu1 %v2031_v24 }
 0x1e3   : > { %1506 = vmatpush1.bf16.msra.mxu0 %v2028_v25  ;;  %1826 = vmatpush3.bf16.msra.mxu1 %v2032_v26 }
 0x1e4   : > { %1507 = vmatprep.subr.bf16.mxu0 %v2035_v27  ;;  %1827 = vmatprep.subr.bf16.mxu1 %v2036_v28  ;;  %v836_v27 = vsub.s32 6, %v2399_v16 }
 0x1e7   : > { %1508 = vmatpush1.bf16.msra.mxu0 %v2033_v29  ;;  %1828 = vmatpush3.bf16.msra.mxu1 %v2037_v30  ;;  %v837_v29 = vrot.slane %v808_v4, %v836_v27 }
 0x1e8   : > { %1509 = vmatprep.subr.bf16.mxu0 %v2040_v31  ;;  %1829 = vmatprep.subr.bf16.mxu1 %v2041_v32 }
 0x1eb   : > { %1510 = vmatpush1.bf16.msra.mxu0 %v2038_v33  ;;  %1830 = vmatpush3.bf16.msra.mxu1 %v2042_v34 }
 0x1ec   : > { %1511 = vmatprep.subr.bf16.mxu0 %v2045_v35  ;;  %1831 = vmatprep.subr.bf16.mxu1 %v2046_v36  ;;  %v828_v36 = vsub.s32 4, %v2399_v16 }
 0x1ef   : > { %1512 = vmatpush1.bf16.msra.mxu0 %v2043_v37  ;;  %1832 = vmatpush3.bf16.msra.mxu1 %v2047_v38  ;;  %v832_v37 = vsub.s32 5, %v2399_v16  ;;  %v829_v38 = vrot.slane %v808_v4, %v828_v36 }
 0x1f0   : > { %1513 = vmatprep.subr.bf16.mxu0 %v2050_v39  ;;  %1833 = vmatprep.subr.bf16.mxu1 %v2051_v40 }
 0x1f1   : > { %v833_v39 = vrot.slane %v808_v4, %v832_v37 }
 0x1f3   : > { %1514 = vmatpush1.bf16.msra.mxu0 %v2048_v41  ;;  %1834 = vmatpush3.bf16.msra.mxu1 %v2052_v42 }
 0x1f4   : > { %1515 = vmatprep.subr.bf16.mxu0 %v2055_v43  ;;  %1835 = vmatprep.subr.bf16.mxu1 %v2056_v44 }
 0x1f7   : > { %1516 = vmatpush1.bf16.msra.mxu0 %v2053_v45  ;;  %1836 = vmatpush3.bf16.msra.mxu1 %v2057_v46 }
 0x1f8   : > { %1517 = vmatprep.subr.bf16.mxu0 %v2060_v47  ;;  %1837 = vmatprep.subr.bf16.mxu1 %v2061_v48 }
 0x1fb   : > { %1518 = vmatpush1.bf16.msra.mxu0 %v2058_v49  ;;  %1838 = vmatpush3.bf16.msra.mxu1 %v2062_v50 }
 0x1fc   : > { %1519 = vmatprep.subr.bf16.mxu0 %v2065_v51 }
 0x1fe   : > { %1577 = vmatmul.mubr.bf16.vlgmr.msra.gmra.mrb[8].mxu1 %v2534_v22 }
 0x1ff   : > { %1520 = vmatpush1.bf16.msra.mxu0 %v2063_v52 }
 0x200   : > { %1521 = vmatprep.subr.bf16.mxu0 %v2068_v53 }
 0x203   : > { %1522 = vmatpush1.bf16.msra.mxu0 %v2066_v54 }
 0x204   : > { %1523 = vmatprep.subr.bf16.mxu0 %v2071_v55 }
 0x207   : > { %1524 = vmatpush1.bf16.msra.mxu0 %v2069_v56 }
 0x208   : > { %1525 = vmatprep.subr.bf16.mxu0 %v2074_v57 }
 0x20b   : > { %1526 = vmatpush1.bf16.msra.mxu0 %v2072_v58 }
 0x20c   : > { %1527 = vmatprep.subr.bf16.mxu0 %v2077_v59 }
 0x20f   : > { %1528 = vmatpush1.bf16.msra.mxu0 %v2075_v60 }
 0x210   : > { %1529 = vmatprep.subr.bf16.mxu0 %v2080_v61 }
 0x213   : > { %1530 = vmatpush1.bf16.msra.mxu0 %v2078_v62 }
 0x214   : > { %1531 = vmatprep.subr.bf16.mxu0 %v2083_v63 }
 0x217   : > { %1532 = vmatpush1.bf16.msra.mxu0 %v2081_v0 }
 0x218   : > { %1533 = vmatprep.subr.bf16.mxu0 %v2086_v1 }
 0x21b   : > { %1534 = vmatpush1.bf16.msra.mxu0 %v2084_v2 }
 0x21e   : > { %1536 = vmatmul.mubr.bf16.vlgmr.msra.gmra.mrb[8].mxu0 %v2534_v22 }
 0x2b1   : > { %v1455_v10 = vpop.f32.mrb[4].mxu0  ;;  %v1496_v11 = vpop.f32.mrb[4].mxu1 }
 0x2b2   : > { %v1456_v12 = vadd.f32 %v1455_v10, %v813_v6  ;;  %v1497_v13 = vadd.f32 %v1496_v11, %v821_v7  ;;  %v1457_v14 = vpop.f32.mrb[5].mxu0  ;;  %v1498_v15 = vpop.f32.mrb[5].mxu1 }
 0x2b3   : > { %v1458_v18 = vadd.f32 %v1457_v14, %v817_v8  ;;  %v1499_v20 = vadd.f32 %v1498_v15, %v825_v9  ;;  %v1459_v21 = vpop.f32.mrb[6].mxu0  ;;  %v1500_v22 = vpop.f32.mrb[6].mxu1 }
 0x2b4   : > { %2087 = vtanh.f32 %v1456_v12  ;;  %v1460_v23 = vpop.f32.mrb[7].mxu0  ;;  %v1501_v24 = vpop.f32.mrb[7].mxu1 }
 0x2b5   : > { %2089 = vtanh.f32 %v1497_v13 }
 0x2b6   : > { %2091 = vtanh.f32 %v1458_v18 }
 0x2b7   : > { %2093 = vtanh.f32 %v1499_v20 }
 0x2be   : > { %v2088_v17 = vpop.eup %2087 }
 0x2bf   : > { %v2090_v19 = vpop.eup %2089  ;;  %1591 = vst [vmem:[%s2683_s21] sm:$0xff] %v2088_v17 }
 0x2c0   : > { %v2092_v25 = vpop.eup %2091  ;;  %1593 = vst [vmem:[%s2683_s21 + $0x10] sm:$0xff] %v2090_v19 }
 0x2c1   : > { %v2094_v26 = vpop.eup %2093  ;;  %1592 = vst [vmem:[%s2683_s21 + $0x8] sm:$0xff] %v2092_v25 }
 0x2c2   : > { %1594 = vst [vmem:[%s2683_s21 + $0x18] sm:$0xff] %v2094_v26 }
 0x2d1   : > { %v1839_v28 = vpop.f32.mrb[8].mxu1 }
 0x2d2   : > { %v1840_v30 = vpop.f32.mrb[9].mxu1 }
 0x2d3   : > { %v1841_v31 = vadd.f32 %v1840_v30, %v1839_v28  ;;  %v1842_v32 = vpop.f32.mrb[10].mxu1 }
 0x2d4   : > { %v1843_v33 = vpop.f32.mrb[11].mxu1 }
 0x2d5   : > { %v1579_v34 = vadd.f32 %v1841_v31, %v837_v29 }
 0x2d7   : > { %2095 = vtanh.f32 %v1579_v34 }
 0x2e1   : > { %v2096_v35 = vpop.eup %2095 }
 0x2e2   : > { %1598 = vst.msk [vmem:[%s2683_s21 + $0x30] sm:$0xff] %vm1597_vm0, %v2096_v35 }
 0x2f1   : > { %v1537_v40 = vpop.f32.mrb[8].mxu0 }
 0x2f2   : > { %v1538_v41 = vadd.f32 %v1537_v40, %v829_v38  ;;  %v1539_v42 = vpop.f32.mrb[9].mxu0 }
 0x2f3   : > { %v1540_v43 = vadd.f32 %v1539_v42, %v833_v39  ;;  %v1541_v44 = vpop.f32.mrb[10].mxu0 }
 0x2f4   : > { %2097 = vtanh.f32 %v1538_v41  ;;  %v1542_v45 = vpop.f32.mrb[11].mxu0 }
 0x2f5   : > { %2099 = vtanh.f32 %v1540_v43 }
 0x2fe   : > { %v2098_v46 = vpop.eup %2097 }
 0x2ff   : > { %v2100_v47 = vpop.eup %2099  ;;  %1595 = vst [vmem:[%s2683_s21 + $0x20] sm:$0xff] %v2098_v46 }
 0x300   : > { %1596 = vst [vmem:[%s2683_s21 + $0x28] sm:$0xff] %v2100_v47 }
 0x301 PF: > { %s17_s24 = sadd.s32 1, %s2107_s24  }
 0x302   : > { %p14_p4 = scmp.ge.s32.totalorder %s17_s24, 4  }
 0x304   :  { %16 = sbr.rel (!%p14_p4) target bundleno = 1 (0x1), region = 78 }

</bundles_post_ra>
